<compile_context>
chip_gen: v7x
topology: tpu7x:2x2x1
jax: 0.10.0
libtpu: 0.0.40
codegen_flags: <defaults>
</compile_context>

<pallas_src>
import jax
import jax.numpy as jnp
import numpy as np
from jax.experimental import pallas as pl
from jax.experimental.pallas import tpu as pltpu


def _relu_kan_kernel(xe_ref, lo_ref, hi_ref, w_ref, b_ref, o_ref):
    """One batch tile of ReLU-KAN.

    xe_ref: (TB, K)     x expanded along K = I*GK (xe[:, i*GK+j] == x[:, i]), f32
    lo_ref: (1, K)      flattened phase_low, f32
    hi_ref: (1, K)      flattened phase_height, f32
    w_ref : (K, O_pad)  conv weight, permuted + r^2-folded + zero-padded, bf16
    b_ref : (1, O_pad)  conv bias, zero-padded, f32
    o_ref : (TB, O_pad) output tile, f32
    """
    xe = xe_ref[...]
    lo = lo_ref[...]
    hi = hi_ref[...]

    # Squared-ReLU basis; the scalar r^2 is folded into the weight host-side.
    basis = jnp.maximum(xe - lo, 0.0) * jnp.maximum(hi - xe, 0.0)      # (TB, K) f32
    f = basis * basis

    # Single MXU contraction over K = I*GK; bf16 operands, f32 accumulation.
    acc = jnp.dot(f.astype(w_ref.dtype), w_ref[...],
                  preferred_element_type=jnp.float32)                  # (TB, O_pad)
    o_ref[...] = (acc + b_ref[...]).astype(o_ref.dtype)


def relu_kan_layer(x, phase_low, phase_height, conv_w, conv_b, g, k):
    """Pallas implementation of ReLUKANLayer.forward.

    x       : (B, input_size, 1) float32
    returns : (B, output_size, 1) float32
    """
    B = x.shape[0]
    I = phase_low.shape[0]
    GK = g + k
    O = conv_w.shape[0]
    K = I * GK
    r = 4.0 * g * g / ((k + 1) * (k + 1))
    r2 = float(r) * float(r)                      # feat is squared -> fold r^2

    # ---- trace-time layout plumbing (no per-element math hoisted) -------------
    x2d = x.reshape(B, I).astype(jnp.float32)
    xe = jnp.repeat(x2d, GK, axis=1)              # (B, K): xe[:, i*GK+j] = x[:, i]
    lo = phase_low.reshape(1, K).astype(jnp.float32)
    hi = phase_height.reshape(1, K).astype(jnp.float32)

    # PyTorch reshape trick: feat flat index i*GK+j equals the conv's flat index
    # h*I+w, so conv_w.reshape(O, GK*I).T is exactly the (K, O) GEMM weight.
    O_pad = max(128, pl.cdiv(O, 128) * 128)       # lane-dense output stores
    w_flat = conv_w.reshape(O, K).T.astype(jnp.float32) * r2            # (K, O)
    w_pad = jnp.zeros((K, O_pad), jnp.float32).at[:, :O].set(w_flat)
    w_pad = w_pad.astype(jnp.bfloat16)            # bf16 MXU operand
    b_pad = jnp.zeros((1, O_pad), jnp.float32).at[0, :O].set(
        conv_b.reshape(O).astype(jnp.float32))

    # ---- batch tiling: stays far below the 32 MiB scoped-VMEM default and
    #      leaves headroom on v7x's 64 MiB physical VMEM -----------------------
    if B >= 512:
        TB = 512
    elif B >= 128:
        TB = 128
    else:
        TB = ((B + 7) // 8) * 8                   # sublane-aligned single tile
    B_pad = pl.cdiv(B, TB) * TB
    if B_pad != B:
        xe = jnp.pad(xe, ((0, B_pad - B), (0, 0)))

    out = pl.pallas_call(
        _relu_kan_kernel,
        out_shape=jax.ShapeDtypeStruct((B_pad, O_pad), jnp.float32),
        grid=(B_pad // TB,),
        in_specs=[
            pl.BlockSpec((TB, K), lambda b: (b, 0)),        # x tile (pipelined)
            pl.BlockSpec((1, K), lambda b: (0, 0)),         # phase_low (resident)
            pl.BlockSpec((1, K), lambda b: (0, 0)),         # phase_height
            pl.BlockSpec((K, O_pad), lambda b: (0, 0)),     # weight (resident)
            pl.BlockSpec((1, O_pad), lambda b: (0, 0)),     # bias
        ],
        out_specs=pl.BlockSpec((TB, O_pad), lambda b: (b, 0)),
        compiler_params=pltpu.CompilerParams(
            dimension_semantics=("parallel",),              # 2-TC sharding on v7x
        ),
    )(xe, lo, hi, w_pad, b_pad)

    return out[:B, :O].reshape(B, O, 1)


def relu_kan_ref(x, phase_low, phase_height, conv_w, conv_b, g, k):
    """Pure-JAX f32 reference mirroring the PyTorch ops (incl. the memory reshape)."""
    r = 4.0 * g * g / ((k + 1) * (k + 1))
    B, I, _ = x.shape
    GK = g + k
    O = conv_w.shape[0]
    x1 = jax.nn.relu(x - phase_low)          # (B, I, GK)
    x2 = jax.nn.relu(phase_height - x)       # (B, I, GK)
    f = x1 * x2 * r
    f = f * f
    f = f.reshape(B, 1, GK, I)               # row-major reinterpret, as in torch
    out = jnp.einsum('bchw,ochw->bo', f, conv_w) + conv_b
    return out.reshape(B, O, 1)


if __name__ == "__main__":
    # Module hyper-parameters (shapes consistent with ReLUKANLayer.__init__).
    input_size, g, k, output_size = 8, 5, 3, 16
    GK = g + k
    batch = 256                               # 2 grid steps with TB=128

    # Deterministic parameter init.
    phase_low_1d = np.arange(-k, g, dtype=np.float32) / g                  # (GK,)
    phase_height_1d = phase_low_1d + (k + 1) / g                           # (GK,)
    phase_low = jnp.asarray(np.tile(phase_low_1d, (input_size, 1)))        # (I, GK)
    phase_height = jnp.asarray(np.tile(phase_height_1d, (input_size, 1)))  # (I, GK)

    key = jax.random.PRNGKey(0)
    kw, kb, kx = jax.random.split(key, 3)
    conv_w = 0.1 * jax.random.normal(kw, (output_size, 1, GK, input_size), jnp.float32)
    conv_b = 0.1 * jax.random.normal(kb, (output_size,), jnp.float32)

    # Input: (batch, input_size, 1), values in [0, 1] where the basis is active.
    x = jax.random.uniform(kx, (batch, input_size, 1), jnp.float32)

    out = relu_kan_layer(x, phase_low, phase_height, conv_w, conv_b, g, k)
    out = jax.block_until_ready(out)

    ref = relu_kan_ref(x, phase_low, phase_height, conv_w, conv_b, g, k)
    assert out.shape == (batch, output_size, 1), out.shape
    # bf16 MXU operands (f32 accumulation) -> relaxed tolerance vs the f32 reference.
    np.testing.assert_allclose(np.asarray(out), np.asarray(ref), rtol=2e-2, atol=2e-2)

    print("KERNEL_OK")
</pallas_src>

<mosaic_0001>
module attributes {stable_mosaic.version = 11 : i64} {
  func.func @_relu_kan_kernel(%arg0: i32, %arg1: memref<128x64xf32, #tpu.memory_space<vmem>>, %arg2: memref<1x64xf32, #tpu.memory_space<vmem>>, %arg3: memref<1x64xf32, #tpu.memory_space<vmem>>, %arg4: memref<64x128xbf16, #tpu.memory_space<vmem>>, %arg5: memref<1x128xf32, #tpu.memory_space<vmem>>, %arg6: memref<128x128xf32, #tpu.memory_space<vmem>>) attributes {dimension_semantics = [#tpu.dimension_semantics<parallel>], iteration_bounds = array<i64: 2>, scalar_prefetch = 0 : i64, scratch_operands = 0 : i64, tpu.core_type = #tpu.core_type<tc>, window_params = [{transform_indices = @transform_0, window_bounds = array<i64: 128, 64>}, {pipeline_mode = #tpu.pipeline_mode<synchronous>, transform_indices = @transform_1, window_bounds = array<i64: 1, 64>}, {pipeline_mode = #tpu.pipeline_mode<synchronous>, transform_indices = @transform_2, window_bounds = array<i64: 1, 64>}, {pipeline_mode = #tpu.pipeline_mode<synchronous>, transform_indices = @transform_3, window_bounds = array<i64: 64, 128>}, {pipeline_mode = #tpu.pipeline_mode<synchronous>, transform_indices = @transform_4, window_bounds = array<i64: 1, 128>}, {transform_indices = @transform_5, window_bounds = array<i64: 128, 128>}]} {
    %c0 = arith.constant 0 : index
    %c0_0 = arith.constant 0 : index
    %0 = vector.load %arg1[%c0, %c0_0] : memref<128x64xf32, #tpu.memory_space<vmem>>, vector<128x64xf32>
    %c0_1 = arith.constant 0 : index
    %c0_2 = arith.constant 0 : index
    %1 = vector.load %arg2[%c0_1, %c0_2] : memref<1x64xf32, #tpu.memory_space<vmem>>, vector<1x64xf32>
    %c0_3 = arith.constant 0 : index
    %c0_4 = arith.constant 0 : index
    %2 = vector.load %arg3[%c0_3, %c0_4] : memref<1x64xf32, #tpu.memory_space<vmem>>, vector<1x64xf32>
    %3 = vector.broadcast %1 : vector<1x64xf32> to vector<128x64xf32>
    %4 = arith.subf %0, %3 : vector<128x64xf32>
    %cst = arith.constant 0.000000e+00 : f32
    %5 = vector.broadcast %cst : f32 to vector<128x64xf32>
    %6 = arith.maximumf %4, %5 : vector<128x64xf32>
    %7 = vector.broadcast %2 : vector<1x64xf32> to vector<128x64xf32>
    %8 = arith.subf %7, %0 : vector<128x64xf32>
    %cst_5 = arith.constant 0.000000e+00 : f32
    %9 = vector.broadcast %cst_5 : f32 to vector<128x64xf32>
    %10 = arith.maximumf %8, %9 : vector<128x64xf32>
    %11 = arith.mulf %6, %10 : vector<128x64xf32>
    %12 = arith.mulf %11, %11 : vector<128x64xf32>
    %13 = arith.truncf %12 : vector<128x64xf32> to vector<128x64xbf16>
    %c0_6 = arith.constant 0 : index
    %c0_7 = arith.constant 0 : index
    %14 = vector.load %arg4[%c0_6, %c0_7] : memref<64x128xbf16, #tpu.memory_space<vmem>>, vector<64x128xbf16>
    %cst_8 = arith.constant dense<0.000000e+00> : vector<128x128xf32>
    %15 = tpu.matmul %13, %14, %cst_8 {dimension_numbers = #tpu.dot_dimension_numbers<[1], [0], [0], [1], [0, 0, 1, 1], [], []>} : vector<128x64xbf16>, vector<64x128xbf16>, vector<128x128xf32> -> vector<128x128xf32>
    %c0_9 = arith.constant 0 : index
    %c0_10 = arith.constant 0 : index
    %16 = vector.load %arg5[%c0_9, %c0_10] : memref<1x128xf32, #tpu.memory_space<vmem>>, vector<1x128xf32>
    %17 = vector.broadcast %16 : vector<1x128xf32> to vector<128x128xf32>
    %18 = arith.addf %15, %17 : vector<128x128xf32>
    %c0_11 = arith.constant 0 : index
    %c0_12 = arith.constant 0 : index
    %19 = vector.load %arg6[%c0_11, %c0_12] : memref<128x128xf32, #tpu.memory_space<vmem>>, vector<128x128xf32>
    tpu.vector_store %arg6[%c0_11, %c0_12], %18 {strides = array<i32>} : memref<128x128xf32, #tpu.memory_space<vmem>>, vector<128x128xf32>,
    return
  }
  func.func @transform_0(%arg0: i32) -> (i32, i32) {
    %c0_i32 = arith.constant 0 : i32
    %c0_i32_0 = arith.constant 0 : i32
    return %arg0, %c0_i32 : i32, i32
  }
  func.func @transform_1(%arg0: i32) -> (i32, i32) {
    %c0_i32 = arith.constant 0 : i32
    %c0_i32_0 = arith.constant 0 : i32
    %c0_i32_1 = arith.constant 0 : i32
    return %c0_i32, %c0_i32_0 : i32, i32
  }
  func.func @transform_2(%arg0: i32) -> (i32, i32) {
    %c0_i32 = arith.constant 0 : i32
    %c0_i32_0 = arith.constant 0 : i32
    %c0_i32_1 = arith.constant 0 : i32
    return %c0_i32, %c0_i32_0 : i32, i32
  }
  func.func @transform_3(%arg0: i32) -> (i32, i32) {
    %c0_i32 = arith.constant 0 : i32
    %c0_i32_0 = arith.constant 0 : i32
    %c0_i32_1 = arith.constant 0 : i32
    return %c0_i32, %c0_i32_0 : i32, i32
  }
  func.func @transform_4(%arg0: i32) -> (i32, i32) {
    %c0_i32 = arith.constant 0 : i32
    %c0_i32_0 = arith.constant 0 : i32
    %c0_i32_1 = arith.constant 0 : i32
    return %c0_i32, %c0_i32_0 : i32, i32
  }
  func.func @transform_5(%arg0: i32) -> (i32, i32) {
    %c0_i32 = arith.constant 0 : i32
    %c0_i32_0 = arith.constant 0 : i32
    return %arg0, %c0_i32 : i32, i32
  }
}

</mosaic_0001>

<bundles_post_ra>
// kernel: tpu_custom_call.1
= control target key start
LH: loop header
LB: loop body
LE: loop exit
PB: predicated region body
PF: predicated region fallthrough
CT: control target
= control target key end

     0   :  { %10 = vsyncpa [#allocation3], 0  ;;  %s1036_s0 = inlined_call_operand.vmem [shape: f32[256,64], index: 0, kind: input, shape index: {}]   ;;  %s1037_s1 = inlined_call_operand.vmem [shape: f32[1,64], index: 1, kind: input, shape index: {}]   ;;  %s1038_s2 = inlined_call_operand.vmem [shape: f32[1,64], index: 2, kind: input, shape index: {}]   ;;  %s1039_s3 = inlined_call_operand.vmem [shape: bf16[64,128], index: 3, kind: input, shape index: {}]   ;;  %s1040_s4 = inlined_call_operand.vmem [shape: f32[1,128], index: 4, kind: input, shape index: {}]   ;;  %s1041_s5 = inlined_call_operand.hbm [shape: f32[256,128], index: 5, kind: output, shape index: {}]  }
   0x1   :  { %12 = vsyncpa [#allocation3 + $0x1], 0  ;;  %s828_s18 = smov 0   ;;  %s830_s19 = smov 0  }
   0x2   :  { %s832_s20 = smov 0   ;;  %s834_s21 = smov 0  }
   0x3 LB: > { %s849_s22 = sadd.s32 4294967295, %s793_s21   ;;  %s614_s23 = sadd.s32 4294967294, %s793_s21   ;;  %s793_s21 = sphi %s834_s21, %s1047_s21   ;;  %s789_s20 = sphi %s832_s20, %s1046_s20   ;;  %s785_s19 = sphi %s830_s19, %s1045_s19   ;;  %s781_s18 = sphi %s828_s18, %s1044_s18  }
   0x4   : > { %s853_s24 = sadd.s32 1, %s793_s21   ;;  %s135_s25 = sadd.s32 1, %s789_s20 }
   0x5   : > { %s132_s26 = ssub.s32 %s793_s21, %s853_s24  ;;  %p145_p0 = scmp.ne.s32.totalorder %s789_s20, %s785_s19 }
   0x6   : > { %p133_p1 = scmp.eq.s32.totalorder %s132_s26, 0  ;;  %p146_p2 = scmp.eq.s32.totalorder %s849_s22, 1 }
   0x7   : > { %p151_p3 = scmp.ne.s32.totalorder %s785_s19, %s781_s18  ;;  %p152_p4 = scmp.eq.s32.totalorder %s614_s23, 1 }
   0x8   : > { %s864_s27 = scalar_select %p133_p1, %s789_s20, %s135_s25  }
   0x9   : > { %p866_p5 = por %p146_p2, %p145_p0  ;;  %p870_p6 = por %p152_p4, %p151_p3 }
   0xa   : > { %p617_p7 = scmp.ge.s32.totalorder %s793_s21, 1  ;;  %p191_p8 = scmp.lt.s32.totalorder %s793_s21, 3 }
   0xc   : > { %p192_p9 = pnand %p617_p7, %p191_p8 }
   0xd   : > { %v727_v0 = vld [vmem:[%s1039_s3] sm:$0xff] (!%p192_p9)   ;;  %s619_s7 = sshll.u32 (!%p192_p9), %s849_s22, 4  ;;  %v728_v1 = vld [vmem:[%s1039_s3 + $0x8] sm:$0xff] (!%p192_p9)   ;;  %v729_v2 = vld [vmem:[%s1039_s3 + $0x10] sm:$0xff] (!%p192_p9)   ;;  %vm400_vm0 = vcmask (!%p192_p9), 523264   ;;  %s216_s6 = sand.u32 (!%p192_p9), 1, %s785_s19  }
   0xe   : > { %195 = sbr.rel (%p192_p9) target bundleno = 289 (0x121), region = 40  ;;  %p220_p10 = scmp.lt.s32.totalorder (!%p192_p9), %s619_s7, 31  ;;  %654 = vmatprep.subr.bf16.mxu0 (!%p192_p9), %v727_v0  ;;  %678 = vmatprep.subr.bf16.mxu1 (!%p192_p9), %v727_v0  ;;  %v889_v3 = vld [vmem:[%s1037_s1] ss:$0 sm:$0xff] (!%p192_p9)  ;;  %v730_v8 = vld [vmem:[%s1039_s3 + $0x18] sm:$0xff] (!%p192_p9)  }
   0xf   : > { %655 = vmatpush3.bf16.msra.mxu0 (!%p192_p9), %v727_v0  ;;  %682 = vmatpush3.bf16.msra.mxu1 (!%p192_p9), %v727_v0  ;;  %v894_v4 = vld [vmem:[%s1038_s2] ss:$0 sm:$0xff] (!%p192_p9)  ;;  %s641_s11 = sshll.u32 (!%p192_p9), %s849_s22, 11  ;;  %s995_s15 = scalar_lea.sflag (!%p192_p9), [#allocation3], %s216_s6 }
  0x10   : > { %656 = vmatprep.subr.bf16.mxu0 (!%p192_p9), %v728_v1  ;;  %679 = vmatprep.subr.bf16.mxu1 (!%p192_p9), %v728_v1  ;;  %s986_s22 = scalar_lea.hbm (!%p192_p9), %s1041_s5, %s641_s11  ;;  %s795_s17 = smov (!%p192_p9), [#allocation2]  }
  0x11   : > { %s735_s23 = sshll.u32 (!%p192_p9), %s795_s17, 4  ;;  %s736_s23 = int_to_ptr.vmem [resolvable:$false] %s735_s23 }
  0x13   : > { %657 = vmatpush3.bf16.msra.mxu0 (!%p192_p9), %v728_v1  ;;  %683 = vmatpush3.bf16.msra.mxu1 (!%p192_p9), %v728_v1 }
  0x14   : > { %658 = vmatprep.subr.bf16.mxu0 (!%p192_p9), %v729_v2  ;;  %680 = vmatprep.subr.bf16.mxu1 (!%p192_p9), %v729_v2 }
  0x15   : > { %s1049_s7 = smov (!%p220_p10, %s619_s7), 31 }
  0x16   : > { %s620_s12 = sshll.u32 %s1049_s7, 3  ;;  %s618_s7 = sshll.u32 %s216_s6, 7 }
  0x17   : > { %s899_s25 = scalar_lea.vmem %s1036_s0, %s620_s12  ;;  %659 = vmatpush3.bf16.msra.mxu0 %v729_v2  ;;  %684 = vmatpush3.bf16.msra.mxu1 %v729_v2  ;;  %s966_s10 = scalar_lea.vmem [#allocation2], %s618_s7 }
  0x18   : > { %v227_v5 = vld [vmem:[%s899_s25] sm:$0xff]  ;;  %v228_v6 = vld [vmem:[%s899_s25 + $0x8] sm:$0xff]  ;;  %v229_v17 = vld [vmem:[%s899_s25 + $0x10] sm:$0xff]  ;;  %660 = vmatprep.subr.bf16.mxu0 %v730_v8  ;;  %681 = vmatprep.subr.bf16.mxu1 %v730_v8  ;;  %s552_s12 = sshll.u32 %s966_s10, 4  ;;  %s988_s12 = int_to_ptr.vmem [resolvable:$true] %s552_s12 }
  0x19   : > { %v235_v7 = vld [vmem:[%s899_s25 + $0x40] sm:$0xff]  ;;  %v251_v9 = vsub.f32 %v227_v5, %v889_v3  ;;  %v252_v10 = vsub.f32 %v228_v6, %v889_v3  ;;  %v289_v11 = vsub.f32 %v894_v4, %v227_v5  ;;  %v236_v12 = vld [vmem:[%s899_s25 + $0x48] sm:$0xff]  ;;  %v290_v13 = vsub.f32 %v894_v4, %v228_v6  ;;  %v230_v18 = vld [vmem:[%s899_s25 + $0x18] sm:$0xff]  ;;  %s731_s16 = scalar_lea.vmem %s988_s12, 2048  ;;  %p738_p0 = scmp.lt.s32.totalorder %s988_s12, %s736_s23 }
  0x1a   : > { %v259_v14 = vsub.f32 %v235_v7, %v889_v3  ;;  %v260_v15 = vsub.f32 %v236_v12, %v889_v3  ;;  %v297_v16 = vsub.f32 %v894_v4, %v235_v7  ;;  %v298_v22 = vsub.f32 %v894_v4, %v236_v12  ;;  %v237_v35 = vld [vmem:[%s899_s25 + $0x50] sm:$0xff]  ;;  %v238_v36 = vld [vmem:[%s899_s25 + $0x58] sm:$0xff]  ;;  %v231_v49 = vld [vmem:[%s899_s25 + $0x20] sm:$0xff]  ;;  %p732_p11 = scmp.ne.s32.totalorder %s988_s12, %s731_s16 }
  0x1b   : > { %v267_v19 = vmax.f32 %v251_v9, 0.0  ;;  %v268_v20 = vmax.f32 %v252_v10, 0.0  ;;  %v305_v21 = vmax.f32 %v289_v11, 0.0  ;;  %v306_v23 = vmax.f32 %v290_v13, 0.0  ;;  %661 = vmatpush3.bf16.msra.mxu0 %v730_v8  ;;  %685 = vmatpush3.bf16.msra.mxu1 %v730_v8  ;;  %v232_v54 = vld [vmem:[%s899_s25 + $0x28] sm:$0xff]  ;;  %v239_v59 = vld [vmem:[%s899_s25 + $0x60] sm:$0xff] }
  0x1c   : > { %v275_v24 = vmax.f32 %v259_v14, 0.0  ;;  %v276_v25 = vmax.f32 %v260_v15, 0.0  ;;  %v313_v26 = vmax.f32 %v297_v16, 0.0  ;;  %v314_v28 = vmax.f32 %v298_v22, 0.0  ;;  %v240_v6 = vld [vmem:[%s899_s25 + $0x68] sm:$0xff]  ;;  %v233_v11 = vld [vmem:[%s899_s25 + $0x30] sm:$0xff]  ;;  %p733_p12 = pnand %p732_p11, %p866_p5 }
  0x1d   : > { %v321_v27 = vmul.f32 %v305_v21, %v267_v19  ;;  %v253_v29 = vsub.f32 %v229_v17, %v889_v3  ;;  %v254_v30 = vsub.f32 %v230_v18, %v889_v3  ;;  %v322_v31 = vmul.f32 %v306_v23, %v268_v20  ;;  %v234_v16 = vld [vmem:[%s899_s25 + $0x38] sm:$0xff] }
  0x1e   : > { %v329_v32 = vmul.f32 %v313_v26, %v275_v24  ;;  %v291_v33 = vsub.f32 %v894_v4, %v229_v17  ;;  %v292_v34 = vsub.f32 %v894_v4, %v230_v18  ;;  %v330_v38 = vmul.f32 %v314_v28, %v276_v25  ;;  %p734_p13 = pneg %p733_p12 }
  0x1f   : > { %v337_v37 = vmul.f32 %v321_v27, %v321_v27  ;;  %v269_v39 = vmax.f32 %v253_v29, 0.0  ;;  %v270_v40 = vmax.f32 %v254_v30, 0.0  ;;  %v338_v41 = vmul.f32 %v322_v31, %v322_v31  ;;  %v241_v29 = vld [vmem:[%s899_s25 + $0x70] sm:$0xff]  ;;  %v242_v30 = vld [vmem:[%s899_s25 + $0x78] sm:$0xff]  ;;  %s737_s25 = scalar_lea.vmem %s736_s23, 4096 }
  0x20   : > { %v345_v42 = vmul.f32 %v329_v32, %v329_v32  ;;  %v307_v43 = vmax.f32 %v291_v33, 0.0  ;;  %v308_v44 = vmax.f32 %v292_v34, 0.0  ;;  %v346_v45 = vmul.f32 %v330_v38, %v330_v38  ;;  %p739_p1 = scmp.lt.s32.totalorder %s737_s25, %s731_s16 }
  0x21   : > { %v261_v46 = vsub.f32 %v237_v35, %v889_v3  ;;  %v262_v47 = vsub.f32 %v238_v36, %v889_v3  ;;  %v299_v48 = vsub.f32 %v894_v4, %v237_v35  ;;  %v353_v50 = vpack.c.bf16 %v338_v41, %v337_v37 }
  0x22   : > { %v323_v51 = vmul.f32 %v307_v43, %v269_v39  ;;  %v324_v52 = vmul.f32 %v308_v44, %v270_v40  ;;  %v300_v53 = vsub.f32 %v894_v4, %v238_v36  ;;  %v357_v55 = vpack.c.bf16 %v346_v45, %v345_v42  ;;  %p740_p2 = por %p739_p1, %p738_p0 }
  0x23   : > { %v277_v56 = vmax.f32 %v261_v46, 0.0  ;;  %v278_v57 = vmax.f32 %v262_v47, 0.0  ;;  %v315_v58 = vmax.f32 %v299_v48, 0.0  ;;  %662 = vmatprep.mubr.msk.bf16.mxu0 %vm400_vm0, %v353_v50  ;;  %v255_v63 = vsub.f32 %v231_v49, %v889_v3 }
  0x24   : > { %v339_v60 = vmul.f32 %v323_v51, %v323_v51  ;;  %v340_v61 = vmul.f32 %v324_v52, %v324_v52  ;;  %v316_v62 = vmax.f32 %v300_v53, 0.0  ;;  %670 = vmatprep.mubr.msk.bf16.mxu1 %vm400_vm0, %v357_v55  ;;  %v256_v1 = vsub.f32 %v232_v54, %v889_v3  ;;  %p741_p3 = pnand %p740_p2, %p734_p13 }
  0x25   : > { %v331_v0 = vmul.f32 %v315_v58, %v277_v56  ;;  %v293_v2 = vsub.f32 %v894_v4, %v231_v49  ;;  %v294_v5 = vsub.f32 %v894_v4, %v232_v54  ;;  %v271_v9 = vmax.f32 %v255_v63, 0.0 }
  0x26   : > { %v354_v7 = vpack.c.bf16 %v340_v61, %v339_v60  ;;  %v332_v8 = vmul.f32 %v316_v62, %v278_v57  ;;  %v263_v10 = vsub.f32 %v239_v59, %v889_v3  ;;  %v272_v13 = vmax.f32 %v256_v1, 0.0 }
  0x27   : > { %v347_v12 = vmul.f32 %v331_v0, %v331_v0  ;;  %v309_v14 = vmax.f32 %v293_v2, 0.0  ;;  %v310_v15 = vmax.f32 %v294_v5, 0.0  ;;  %v264_v18 = vsub.f32 %v240_v6, %v889_v3 }
  0x28   : > { %663 = vmatmul.mubr.msk.bf16.vlgmr.msra.gmra.mrb[0].mxu0 %vm400_vm0, %v354_v7  ;;  %v348_v17 = vmul.f32 %v332_v8, %v332_v8  ;;  %v279_v19 = vmax.f32 %v263_v10, 0.0  ;;  %v301_v20 = vsub.f32 %v894_v4, %v239_v59  ;;  %v302_v23 = vsub.f32 %v894_v4, %v240_v6 }
  0x29   : > { %v325_v21 = vmul.f32 %v309_v14, %v271_v9  ;;  %v326_v22 = vmul.f32 %v310_v15, %v272_v13  ;;  %v257_v24 = vsub.f32 %v233_v11, %v889_v3  ;;  %v280_v26 = vmax.f32 %v264_v18, 0.0 }
  0x2a   : > { %v358_v25 = vpack.c.bf16 %v348_v17, %v347_v12  ;;  %v317_v27 = vmax.f32 %v301_v20, 0.0  ;;  %v258_v28 = vsub.f32 %v234_v16, %v889_v3  ;;  %v318_v33 = vmax.f32 %v302_v23, 0.0 }
  0x2b   : > { %v341_v31 = vmul.f32 %v325_v21, %v325_v21  ;;  %v342_v32 = vmul.f32 %v326_v22, %v326_v22  ;;  %v273_v34 = vmax.f32 %v257_v24, 0.0  ;;  %v295_v37 = vsub.f32 %v894_v4, %v233_v11 }
  0x2c   : > { %671 = vmatmul.mubr.msk.bf16.vlgmr.msra.gmra.mrb[0].mxu1 %vm400_vm0, %v358_v25  ;;  %v333_v35 = vmul.f32 %v317_v27, %v279_v19  ;;  %v274_v36 = vmax.f32 %v258_v28, 0.0  ;;  %v296_v38 = vsub.f32 %v894_v4, %v234_v16  ;;  %v334_v40 = vmul.f32 %v318_v33, %v280_v26 }
  0x2d   : > { %v355_v39 = vpack.c.bf16 %v342_v32, %v341_v31  ;;  %v265_v41 = vsub.f32 %v241_v29, %v889_v3  ;;  %v266_v42 = vsub.f32 %v242_v30, %v889_v3  ;;  %v311_v44 = vmax.f32 %v295_v37, 0.0 }
  0x2e   : > { %v349_v43 = vmul.f32 %v333_v35, %v333_v35  ;;  %v312_v45 = vmax.f32 %v296_v38, 0.0  ;;  %v303_v46 = vsub.f32 %v894_v4, %v241_v29  ;;  %v350_v47 = vmul.f32 %v334_v40, %v334_v40 }
  0x2f   : > { %666 = vmatprep.mubr.msk.bf16.mxu0 %vm400_vm0, %v355_v39  ;;  %v281_v48 = vmax.f32 %v265_v41, 0.0  ;;  %v282_v49 = vmax.f32 %v266_v42, 0.0  ;;  %v304_v50 = vsub.f32 %v894_v4, %v242_v30  ;;  %v327_v51 = vmul.f32 %v311_v44, %v273_v34  ;;  %v623_v4 = vld [vmem:[%s1040_s4] ss:$0 sm:$0xff] }
  0x30   : > { %v328_v52 = vmul.f32 %v312_v45, %v274_v36  ;;  %v319_v53 = vmax.f32 %v303_v46, 0.0  ;;  %v359_v54 = vpack.c.bf16 %v350_v47, %v349_v43 }
  0x31   : > { %v320_v55 = vmax.f32 %v304_v50, 0.0  ;;  %v343_v3 = vmul.f32 %v327_v51, %v327_v51 }
  0x32   : > { %v344_v56 = vmul.f32 %v328_v52, %v328_v52  ;;  %v335_v57 = vmul.f32 %v319_v53, %v281_v48  ;;  %674 = vmatprep.mubr.msk.bf16.mxu1 %vm400_vm0, %v359_v54 }
  0x33   : > { %v336_v58 = vmul.f32 %v320_v55, %v282_v49 }
  0x34   : > { %v356_v59 = vpack.c.bf16 %v344_v56, %v343_v3  ;;  %v351_v60 = vmul.f32 %v335_v57, %v335_v57 }
  0x35   : > { %v352_v61 = vmul.f32 %v336_v58, %v336_v58 }
  0x36   : > { %667 = vmatmul.mubr.msk.bf16.gmra.mrb[4].mxu0 %vm400_vm0, %v356_v59 }
  0x37   : > { %v360_v62 = vpack.c.bf16 %v352_v61, %v351_v60 }
  0x39   : > { %675 = vmatmul.mubr.msk.bf16.gmra.mrb[4].mxu1 %vm400_vm0, %v360_v62 }
  0xfb   : > { %v664_v63 = vpop.f32.mrb[0].mxu0 }
  0xfc   : > { %v468_v0 = vadd.f32 %v664_v63, %v623_v4  ;;  %v459_v1 = vpop.f32.mrb[1].mxu0 }
  0xfd   : > { %v460_v2 = vadd.f32 %v623_v4, %v459_v1  ;;  %v665_v5 = vpop.f32.mrb[2].mxu0 }
  0xfe   : > { %524 = vst [vmem:[%s966_s10 + $0x10] sm:$0xff] %v468_v0  ;;  %v471_v6 = vadd.f32 %v665_v5, %v623_v4  ;;  %v462_v7 = vpop.f32.mrb[3].mxu0 }
  0xff   : > { %v672_v8 = vpop.f32.mrb[0].mxu1  ;;  %522 = vst [vmem:[%s966_s10] sm:$0xff] %v460_v2  ;;  %v463_v9 = vadd.f32 %v623_v4, %v462_v7 }
 0x100   : > { %v500_v10 = vadd.f32 %v672_v8, %v623_v4  ;;  %v491_v11 = vpop.f32.mrb[1].mxu1  ;;  %525 = vst [vmem:[%s966_s10 + $0x18] sm:$0xff] %v471_v6 }
 0x101   : > { %v492_v12 = vadd.f32 %v623_v4, %v491_v11  ;;  %v673_v13 = vpop.f32.mrb[2].mxu1  ;;  %523 = vst [vmem:[%s966_s10 + $0x8] sm:$0xff] %v463_v9 }
 0x102   : > { %532 = vst [vmem:[%s966_s10 + $0x50] sm:$0xff] %v500_v10  ;;  %v503_v14 = vadd.f32 %v673_v13, %v623_v4  ;;  %v494_v15 = vpop.f32.mrb[3].mxu1 }
 0x103   : > { %530 = vst [vmem:[%s966_s10 + $0x40] sm:$0xff] %v492_v12  ;;  %v495_v16 = vadd.f32 %v623_v4, %v494_v15 }
 0x104   : > { %533 = vst [vmem:[%s966_s10 + $0x58] sm:$0xff] %v503_v14 }
 0x105   : > { %531 = vst [vmem:[%s966_s10 + $0x48] sm:$0xff] %v495_v16 }
 0x109   : > { %v668_v17 = vpop.f32.mrb[4].mxu0 }
 0x10a   : > { %v484_v18 = vadd.f32 %v668_v17, %v623_v4  ;;  %v475_v19 = vpop.f32.mrb[5].mxu0 }
 0x10b   : > { %v476_v20 = vadd.f32 %v623_v4, %v475_v19  ;;  %v669_v21 = vpop.f32.mrb[6].mxu0 }
 0x10c   : > { %528 = vst [vmem:[%s966_s10 + $0x30] sm:$0xff] %v484_v18  ;;  %v676_v22 = vpop.f32.mrb[4].mxu1  ;;  %v487_v23 = vadd.f32 %v669_v21, %v623_v4  ;;  %v478_v24 = vpop.f32.mrb[7].mxu0 }
 0x10d   : > { %v516_v25 = vadd.f32 %v676_v22, %v623_v4  ;;  %526 = vst [vmem:[%s966_s10 + $0x20] sm:$0xff] %v476_v20  ;;  %v507_v26 = vpop.f32.mrb[5].mxu1  ;;  %v479_v27 = vadd.f32 %v623_v4, %v478_v24 }
 0x10e   : > { %v508_v28 = vadd.f32 %v623_v4, %v507_v26  ;;  %529 = vst [vmem:[%s966_s10 + $0x38] sm:$0xff] %v487_v23  ;;  %v677_v29 = vpop.f32.mrb[6].mxu1 }
 0x10f   : > { %536 = vst [vmem:[%s966_s10 + $0x70] sm:$0xff] %v516_v25  ;;  %v519_v30 = vadd.f32 %v677_v29, %v623_v4  ;;  %527 = vst [vmem:[%s966_s10 + $0x28] sm:$0xff] %v479_v27  ;;  %v510_v31 = vpop.f32.mrb[7].mxu1 }
 0x110   : > { %534 = vst [vmem:[%s966_s10 + $0x60] sm:$0xff] %v508_v28  ;;  %v511_v32 = vadd.f32 %v623_v4, %v510_v31 }
 0x111   : > { %537 = vst [vmem:[%s966_s10 + $0x78] sm:$0xff] %v519_v30 }
 0x112   : > { %535 = vst [vmem:[%s966_s10 + $0x68] sm:$0xff] %v511_v32 }
 0x113   : > { %744 = shalt.err (!%p741_p3)
}
 0x114   : > { %s745_s26 = scalar_lea.hbm %s986_s22, 2048  ;;  %s749_s7 = scalar_lea.hbm %s1041_s5, 4096 }
 0x115   : > { %p746_p4 = scmp.ne.s32.totalorder %s986_s22, %s745_s26  ;;  %p750_p9 = scmp.lt.u32.totalorder %s986_s22, %s1041_s5 }
 0x116   : > { %p751_p10 = scmp.lt.u32.totalorder %s749_s7, %s745_s26  ;;  %p753_p12 = scmp.lt.u32.totalorder %s745_s26, %s986_s22 }
 0x117   : > { %p747_p7 = pnand %p746_p4, %p866_p5 }
 0x118   : > { %p752_p11 = por %p751_p10, %p750_p9 }
 0x119   : > { %p748_p8 = pneg %p747_p7 }
 0x11a   : > { %p754_p13 = por %p753_p12, %p752_p11 }
 0x11c   : > { %p755_p0 = pnand %p754_p13, %p748_p8 }
 0x11e   : > { %758 = shalt.err (!%p755_p0)
}
 0x11f   : > { %s796_s10 = smov 128   ;;  %s797_s11 = smov 8  }
 0x120   : > { %686 = dma.vmem_to_hbm [thread:$0]  (%p866_p5), %s988_s12, 2048, %s986_s22, %s995_s15, %s796_s10, %s796_s10, %s797_s11  }
 0x121 PF: > { %p692_p1 = scmp.ge.s32.totalorder %s793_s21, 2  ;;  %s567_s13 = sand.u32 1, %s781_s18  }
 0x122   : > { %s568_s14 = scalar_lea.sflag [#allocation3], %s567_s13 }
 0x123   : > { %p689_p2 = pnand %p692_p1, %p870_p6 }
 0x125   : > { %776 = dma.done.wait (!%p689_p2), %s568_s14, 2048  }
 0x126   : > { %778 = vsyncadd (!%p689_p2), %s568_s14, 4294965248  ;;  %p15_p3 = scmp.ge.s32.totalorder %s853_s24, 4   ;;  %s1044_s18 = smov %s785_s19 }
 0x127   : > { %s1045_s19 = smov %s789_s20  ;;  %s1046_s20 = smov %s864_s27 }
 0x128   : > { %s1047_s21 = smov %s853_s24  ;;  %17 = sbr.rel (!%p15_p3) target bundleno = 3 (0x3), region = 75 }
 0x12f   :  { %573 = vsyncpa [#allocation3], 1 }
 0x130   :  { %575 = vsyncpa [#allocation3 + $0x1], 1 }

</bundles_post_ra>
